<compile_context>
chip_gen: v7x
topology: tpu7x:2x2x1
jax: 0.10.0
libtpu: 0.0.40
codegen_flags: <defaults>
</compile_context>

<pallas_src>
import math
import numpy as np
import jax
import jax.numpy as jnp
from jax.experimental import pallas as pl
from jax.experimental.pallas import tpu as pltpu


# ------------------ parameter / constant construction (plain numpy / JAX glue) ------------------

def _orthonormal_matrix_from_angles(angles, mus):
    """tansacnet OrthonormalMatrixGenerationSystem (analysis form):
       R = diag(mus) @ prod_of_planar_Givens_rotations(angles)."""
    n = len(mus)
    R = np.eye(n, dtype=np.float64)
    iAng = 0
    for iTop in range(n - 1):
        vt = R[iTop, :].copy()
        for iBtm in range(iTop + 1, n):
            c = math.cos(float(angles[iAng]))
            s = math.sin(float(angles[iAng]))
            vb = R[iBtm, :].copy()
            R[iBtm, :] = s * vt + c * vb
            vt = c * vt - s * vb
            iAng += 1
        R[iTop, :] = vt
    return np.diag(np.asarray(mus, np.float64)) @ R


def _ortho_dct_matrix(N):
    """Orthonormal DCT-II matrix C (forward).  Inverse (IDCT, norm='ortho') is C.T."""
    k = np.arange(N, dtype=np.float64)[:, None]
    n = np.arange(N, dtype=np.float64)[None, :]
    C = np.sqrt(2.0 / N) * np.cos(np.pi * (2.0 * n + 1.0) * k / (2.0 * N))
    C[0, :] *= 1.0 / np.sqrt(2.0)
    return C


def _build_E0T(sy, sx):
    """Fixed block-IDCT synthesis matrix: flattened (row-major) pixel block =
    E0T @ coefficient vector (LsunBlockIdct2dLayer.permuteIdctCoefs_ + idct_2d)."""
    ndecs = sy * sx
    dest = []
    for a in range(0, sy, 2):            # cee -> V[0::2, 0::2]
        for b in range(0, sx, 2):
            dest.append(a * sx + b)
    for a in range(1, sy, 2):            # coo -> V[1::2, 1::2]
        for b in range(1, sx, 2):
            dest.append(a * sx + b)
    for a in range(1, sy, 2):            # coe -> V[1::2, 0::2]
        for b in range(0, sx, 2):
            dest.append(a * sx + b)
    for a in range(0, sy, 2):            # ceo -> V[0::2, 1::2]
        for b in range(1, sx, 2):
            dest.append(a * sx + b)
    P = np.zeros((ndecs, ndecs), dtype=np.float64)
    for c, d in enumerate(dest):
        P[d, c] = 1.0
    Cy = _ortho_dct_matrix(sy)
    Cx = _ortho_dct_matrix(sx)
    # Y = Cy^T @ V @ Cx  ->  vec_rowmajor(Y) = kron(Cy^T, Cx^T) @ vec_rowmajor(V)
    return np.kron(Cy.T, Cx.T) @ P


def make_final_rotation_params(key, nrows, ncols, stride, mus=1, no_dc_leakage=True):
    """Deterministic init of LsunFinalRotation2dLayer parameters (non-zero angles so the
    kernel is non-trivial, while honoring the no_dc_leakage constraint)."""
    sy, sx = stride
    ndecs = sy * sx
    ps = int(math.ceil(ndecs / 2.0))
    pa = int(math.floor(ndecs / 2.0))
    nblks = nrows * ncols
    nAngsW = ps * (ps - 1) // 2
    nAngsU = pa * (pa - 1) // 2
    kW, kU = jax.random.split(key)
    anglesW = np.asarray(
        jax.random.uniform(kW, (nblks, max(nAngsW, 1)), minval=-math.pi, maxval=math.pi),
        np.float64)[:, :nAngsW]
    anglesU = np.asarray(
        jax.random.uniform(kU, (nblks, max(nAngsU, 1)), minval=-math.pi, maxval=math.pi),
        np.float64)[:, :nAngsU]
    musW = float(mus) * np.ones((nblks, ps))
    musU = float(mus) * np.ones((nblks, pa))
    if no_dc_leakage:
        musW[:, 0] = 1.0
        anglesW[:, : ps - 1] = 0.0
    # Synthesis mode applies the transpose of the analysis matrix.
    W0T = np.stack([_orthonormal_matrix_from_angles(anglesW[b], musW[b]).T for b in range(nblks)])
    U0T = np.stack([_orthonormal_matrix_from_angles(anglesU[b], musU[b]).T for b in range(nblks)])
    return jnp.asarray(W0T, jnp.float32), jnp.asarray(U0T, jnp.float32)


# ------------------------------------- Pallas kernels -------------------------------------

def _make_kernel_2x2():
    """stride (2,2): rot carries 0.5*W0^T / 0.5*U0^T; block IDCT = add/sub butterflies.
    All operands are full (Rt, Ct) sublane/lane-dense tiles; accumulation in f32."""
    def kernel(x_ref, rot_ref, o_ref):
        # x_ref:   (4, Rt, Ct)  coefficient planes (d, block-row, block-col)
        # rot_ref: (8, Rt, Ct)  [0.5*W00, 0.5*W01, 0.5*W10, 0.5*W11,
        #                        0.5*U00, 0.5*U01, 0.5*U10, 0.5*U11] per block
        # o_ref:   (4, Rt, Ct)  row-major flattened 2x2 pixel block per block
        f32 = jnp.float32
        x0 = x_ref[0].astype(f32)
        x1 = x_ref[1].astype(f32)
        x2 = x_ref[2].astype(f32)
        x3 = x_ref[3].astype(f32)
        # per-block rotation V0~ = blockdiag(0.5*W0^T, 0.5*U0^T) as lane-aligned VPU FMAs
        z0 = rot_ref[0] * x0 + rot_ref[1] * x1
        z1 = rot_ref[2] * x0 + rot_ref[3] * x1
        z2 = rot_ref[4] * x2 + rot_ref[5] * x3
        z3 = rot_ref[6] * x2 + rot_ref[7] * x3
        # fixed 2x2 block IDCT E0~ (its 0.5 already folded into rot) as butterflies
        s02 = z0 + z2
        d02 = z0 - z2
        s13 = z1 + z3
        d13 = z1 - z3
        dt = o_ref.dtype
        o_ref[0] = (s02 + s13).astype(dt)
        o_ref[1] = (s02 - s13).astype(dt)
        o_ref[2] = (d02 - d13).astype(dt)
        o_ref[3] = (d02 + d13).astype(dt)
    return kernel


def _make_kernel_generic(ps, pa, ndecs, E0T_np):
    """Any even-product stride: E0T entries folded in as compile-time scalar coefficients."""
    nW = ps * ps
    def kernel(x_ref, rot_ref, o_ref):
        xs = [x_ref[d].astype(jnp.float32) for d in range(ndecs)]
        zs = []
        for i in range(ps):
            acc = rot_ref[i * ps] * xs[0]
            for j in range(1, ps):
                acc = acc + rot_ref[i * ps + j] * xs[j]
            zs.append(acc)
        for i in range(pa):
            acc = rot_ref[nW + i * pa] * xs[ps]
            for j in range(1, pa):
                acc = acc + rot_ref[nW + i * pa + j] * xs[ps + j]
            zs.append(acc)
        for p in range(ndecs):
            acc = None
            for d in range(ndecs):
                c = float(E0T_np[p, d])
                if c == 0.0:
                    continue
                if acc is None:
                    acc = zs[d] if c == 1.0 else (-zs[d] if c == -1.0 else zs[d] * c)
                elif c == 1.0:
                    acc = acc + zs[d]
                elif c == -1.0:
                    acc = acc - zs[d]
                else:
                    acc = acc + zs[d] * c
            if acc is None:
                acc = jnp.zeros_like(xs[0])
            o_ref[p] = acc.astype(o_ref.dtype)
    return kernel


def _choose_tiles(nrows_p, ncols_p, max_elems=65536, max_ct=2048):
    """Rt: multiple of 8 dividing nrows_p; Ct: multiple of 128 dividing ncols_p.
    Rt*Ct <= max_elems keeps the double-buffered working set (<= ~8 MiB) well inside
    the VMEM budget on every generation (incl. v7x 64 MiB) while amortizing the
    ~0.35 us fixed per-step overhead."""
    ct = 128
    while ct * 2 <= max_ct and ncols_p % (ct * 2) == 0 and 8 * (ct * 2) <= max_elems:
        ct *= 2
    rt = 8
    while rt * 2 <= nrows_p and nrows_p % (rt * 2) == 0 and (rt * 2) * ct <= max_elems:
        rt *= 2
    return rt, ct


def lsun_synthesis_2d(x, W0T, U0T, stride):
    """x: (N, nrows, ncols, nDecs) subband coefficients -> (N, 1, H, W) image."""
    N, nrows, ncols, ndecs = x.shape
    sy, sx = stride
    assert ndecs == sy * sx
    ps = int(W0T.shape[-1])
    pa = int(U0T.shape[-1])
    nblks = nrows * ncols
    nrot = ps * ps + pa * pa

    is_2x2 = (sy == 2 and sx == 2)
    E0T_np = _build_E0T(sy, sx)
    # For (2,2) every E0T entry is +-0.5: fold the 0.5 (exact in f32) into the rotation
    # slab and run the IDCT stage as pure add/sub butterflies inside the kernel.
    rot_scale = 0.5 if is_2x2 else 1.0

    # Packed per-block rotation slab (nrot, nrows, ncols): only the nonzero blockdiag
    # entries ship to HBM; same (sublane, lane) layout as the coefficients; kept f32.
    rot = jnp.concatenate(
        [(W0T * rot_scale).reshape(nblks, ps * ps),
         (U0T * rot_scale).reshape(nblks, pa * pa)], axis=1)
    rot = rot.T.reshape(nrot, nrows, ncols).astype(jnp.float32)

    # Coefficient slab (N, ndecs, nrows, ncols): block-rows on sublanes, block-cols on lanes.
    xT = x.transpose(0, 3, 1, 2)

    # Pad to full (8, 128) tiles: legal block shapes + unmasked lane-dense stores.
    nrows_p = -(-nrows // 8) * 8
    ncols_p = -(-ncols // 128) * 128
    pr, pc = nrows_p - nrows, ncols_p - ncols
    if pr or pc:
        xT = jnp.pad(xT, ((0, 0), (0, 0), (0, pr), (0, pc)))
        rot = jnp.pad(rot, ((0, 0), (0, pr), (0, pc)))

    Rt, Ct = _choose_tiles(nrows_p, ncols_p)
    grid = (nrows_p // Rt, ncols_p // Ct, N)

    kernel = _make_kernel_2x2() if is_2x2 else _make_kernel_generic(ps, pa, ndecs, E0T_np)

    # Batch is the innermost grid axis and the rot index_map ignores it, so the rotation
    # tile's block index is unchanged across samples and its DMA is skipped.
    y = pl.pallas_call(
        kernel,
        out_shape=jax.ShapeDtypeStruct((N, ndecs, nrows_p, ncols_p), x.dtype),
        grid_spec=pltpu.PrefetchScalarGridSpec(
            num_scalar_prefetch=0,
            grid=grid,
            in_specs=[
                pl.BlockSpec((None, ndecs, Rt, Ct), lambda i, j, n: (n, 0, i, j)),
                pl.BlockSpec((nrot, Rt, Ct), lambda i, j, n: (0, i, j)),
            ],
            out_specs=pl.BlockSpec((None, ndecs, Rt, Ct), lambda i, j, n: (n, 0, i, j)),
        ),
        compiler_params=pltpu.CompilerParams(
            dimension_semantics=("parallel", "parallel", "parallel"),
            vmem_limit_bytes=32 * 1024 * 1024),
    )(xT, rot)

    if pr or pc:
        y = y[:, :, :nrows, :ncols]

    # De-blocking: y[n, a*sx+b, r, c] -> img[n, r*sy+a, c*sx+b]
    # (single XLA transpose; see TODO at top about fusing the lane interleave in-kernel)
    img = y.reshape(N, sy, sx, nrows, ncols).transpose(0, 3, 1, 4, 2)
    return img.reshape(N, 1, nrows * sy, ncols * sx)


# ------------------------------------------ main ------------------------------------------

if __name__ == "__main__":
    key = jax.random.PRNGKey(0)
    stride = (2, 2)               # module default
    input_size = (16, 16)         # small but multiple of strides
    N = 2
    nrows = input_size[0] // stride[0]
    ncols = input_size[1] // stride[1]
    ndecs = stride[0] * stride[1]

    kx, kp = jax.random.split(key)
    x = jax.random.normal(kx, (N, nrows, ncols, ndecs), jnp.float32)
    W0T, U0T = make_final_rotation_params(kp, nrows, ncols, stride, mus=1, no_dc_leakage=True)

    out = jax.block_until_ready(lsun_synthesis_2d(x, W0T, U0T, stride))

    # pure-JAX reference of the same forward path (V0~ rotation then E0~ block IDCT)
    ps = W0T.shape[-1]
    Rn = jnp.zeros((nrows * ncols, ndecs, ndecs), jnp.float32)
    Rn = Rn.at[:, :ps, :ps].set(W0T).at[:, ps:, ps:].set(U0T)
    E0T = jnp.asarray(_build_E0T(*stride), jnp.float32)
    xf = x.reshape(N, nrows * ncols, ndecs)
    z = jnp.einsum('bij,nbj->nbi', Rn, xf)
    yr = jnp.einsum('pd,nbd->nbp', E0T, z)
    ref = yr.reshape(N, nrows, ncols, stride[0], stride[1]).transpose(0, 1, 3, 2, 4)
    ref = ref.reshape(N, 1, nrows * stride[0], ncols * stride[1])

    assert out.shape == (N, 1, input_size[0], input_size[1])
    assert jnp.allclose(out, ref, atol=1e-5, rtol=1e-5)
    print("KERNEL_OK")
</pallas_src>

<mosaic_0001>
module attributes {stable_mosaic.version = 11 : i64} {
  func.func @kernel(%arg0: i32, %arg1: i32, %arg2: i32, %arg3: memref<1x4x8x128xf32, #tpu.memory_space<vmem>>, %arg4: memref<8x8x128xf32, #tpu.memory_space<vmem>>, %arg5: memref<1x4x8x128xf32, #tpu.memory_space<vmem>>) attributes {dimension_semantics = [#tpu.dimension_semantics<parallel>, #tpu.dimension_semantics<parallel>, #tpu.dimension_semantics<parallel>], iteration_bounds = array<i64: 1, 1, 2>, scalar_prefetch = 0 : i64, scratch_operands = 0 : i64, tpu.core_type = #tpu.core_type<tc>, window_params = [{transform_indices = @transform_0, window_bounds = array<i64: 1, 4, 8, 128>}, {transform_indices = @transform_1, window_bounds = array<i64: 8, 8, 128>}, {transform_indices = @transform_2, window_bounds = array<i64: 1, 4, 8, 128>}]} {
    %c0 = arith.constant 0 : index
    %c0_0 = arith.constant 0 : index
    %c0_1 = arith.constant 0 : index
    %c0_2 = arith.constant 0 : index
    %0 = vector.load %arg3[%c0, %c0_0, %c0_1, %c0_2] : memref<1x4x8x128xf32, #tpu.memory_space<vmem>>, vector<1x1x8x128xf32>
    %1 = vector.shape_cast %0 : vector<1x1x8x128xf32> to vector<8x128xf32>
    %c0_3 = arith.constant 0 : index
    %c1 = arith.constant 1 : index
    %c0_4 = arith.constant 0 : index
    %c0_5 = arith.constant 0 : index
    %2 = vector.load %arg3[%c0_3, %c1, %c0_4, %c0_5] : memref<1x4x8x128xf32, #tpu.memory_space<vmem>>, vector<1x1x8x128xf32>
    %3 = vector.shape_cast %2 : vector<1x1x8x128xf32> to vector<8x128xf32>
    %c0_6 = arith.constant 0 : index
    %c2 = arith.constant 2 : index
    %c0_7 = arith.constant 0 : index
    %c0_8 = arith.constant 0 : index
    %4 = vector.load %arg3[%c0_6, %c2, %c0_7, %c0_8] : memref<1x4x8x128xf32, #tpu.memory_space<vmem>>, vector<1x1x8x128xf32>
    %5 = vector.shape_cast %4 : vector<1x1x8x128xf32> to vector<8x128xf32>
    %c0_9 = arith.constant 0 : index
    %c3 = arith.constant 3 : index
    %c0_10 = arith.constant 0 : index
    %c0_11 = arith.constant 0 : index
    %6 = vector.load %arg3[%c0_9, %c3, %c0_10, %c0_11] : memref<1x4x8x128xf32, #tpu.memory_space<vmem>>, vector<1x1x8x128xf32>
    %7 = vector.shape_cast %6 : vector<1x1x8x128xf32> to vector<8x128xf32>
    %c0_12 = arith.constant 0 : index
    %c0_13 = arith.constant 0 : index
    %c0_14 = arith.constant 0 : index
    %8 = vector.load %arg4[%c0_12, %c0_13, %c0_14] : memref<8x8x128xf32, #tpu.memory_space<vmem>>, vector<1x8x128xf32>
    %9 = vector.shape_cast %8 : vector<1x8x128xf32> to vector<8x128xf32>
    %10 = arith.mulf %9, %1 : vector<8x128xf32>
    %c1_15 = arith.constant 1 : index
    %c0_16 = arith.constant 0 : index
    %c0_17 = arith.constant 0 : index
    %11 = vector.load %arg4[%c1_15, %c0_16, %c0_17] : memref<8x8x128xf32, #tpu.memory_space<vmem>>, vector<1x8x128xf32>
    %12 = vector.shape_cast %11 : vector<1x8x128xf32> to vector<8x128xf32>
    %13 = arith.mulf %12, %3 : vector<8x128xf32>
    %14 = arith.addf %10, %13 : vector<8x128xf32>
    %c2_18 = arith.constant 2 : index
    %c0_19 = arith.constant 0 : index
    %c0_20 = arith.constant 0 : index
    %15 = vector.load %arg4[%c2_18, %c0_19, %c0_20] : memref<8x8x128xf32, #tpu.memory_space<vmem>>, vector<1x8x128xf32>
    %16 = vector.shape_cast %15 : vector<1x8x128xf32> to vector<8x128xf32>
    %17 = arith.mulf %16, %1 : vector<8x128xf32>
    %c3_21 = arith.constant 3 : index
    %c0_22 = arith.constant 0 : index
    %c0_23 = arith.constant 0 : index
    %18 = vector.load %arg4[%c3_21, %c0_22, %c0_23] : memref<8x8x128xf32, #tpu.memory_space<vmem>>, vector<1x8x128xf32>
    %19 = vector.shape_cast %18 : vector<1x8x128xf32> to vector<8x128xf32>
    %20 = arith.mulf %19, %3 : vector<8x128xf32>
    %21 = arith.addf %17, %20 : vector<8x128xf32>
    %c4 = arith.constant 4 : index
    %c0_24 = arith.constant 0 : index
    %c0_25 = arith.constant 0 : index
    %22 = vector.load %arg4[%c4, %c0_24, %c0_25] : memref<8x8x128xf32, #tpu.memory_space<vmem>>, vector<1x8x128xf32>
    %23 = vector.shape_cast %22 : vector<1x8x128xf32> to vector<8x128xf32>
    %24 = arith.mulf %23, %5 : vector<8x128xf32>
    %c5 = arith.constant 5 : index
    %c0_26 = arith.constant 0 : index
    %c0_27 = arith.constant 0 : index
    %25 = vector.load %arg4[%c5, %c0_26, %c0_27] : memref<8x8x128xf32, #tpu.memory_space<vmem>>, vector<1x8x128xf32>
    %26 = vector.shape_cast %25 : vector<1x8x128xf32> to vector<8x128xf32>
    %27 = arith.mulf %26, %7 : vector<8x128xf32>
    %28 = arith.addf %24, %27 : vector<8x128xf32>
    %c6 = arith.constant 6 : index
    %c0_28 = arith.constant 0 : index
    %c0_29 = arith.constant 0 : index
    %29 = vector.load %arg4[%c6, %c0_28, %c0_29] : memref<8x8x128xf32, #tpu.memory_space<vmem>>, vector<1x8x128xf32>
    %30 = vector.shape_cast %29 : vector<1x8x128xf32> to vector<8x128xf32>
    %31 = arith.mulf %30, %5 : vector<8x128xf32>
    %c7 = arith.constant 7 : index
    %c0_30 = arith.constant 0 : index
    %c0_31 = arith.constant 0 : index
    %32 = vector.load %arg4[%c7, %c0_30, %c0_31] : memref<8x8x128xf32, #tpu.memory_space<vmem>>, vector<1x8x128xf32>
    %33 = vector.shape_cast %32 : vector<1x8x128xf32> to vector<8x128xf32>
    %34 = arith.mulf %33, %7 : vector<8x128xf32>
    %35 = arith.addf %31, %34 : vector<8x128xf32>
    %36 = arith.addf %14, %28 : vector<8x128xf32>
    %37 = arith.subf %14, %28 : vector<8x128xf32>
    %38 = arith.addf %21, %35 : vector<8x128xf32>
    %39 = arith.subf %21, %35 : vector<8x128xf32>
    %40 = arith.addf %36, %38 : vector<8x128xf32>
    %c0_32 = arith.constant 0 : index
    %c0_33 = arith.constant 0 : index
    %c0_34 = arith.constant 0 : index
    %c0_35 = arith.constant 0 : index
    %41 = vector.load %arg5[%c0_32, %c0_33, %c0_34, %c0_35] : memref<1x4x8x128xf32, #tpu.memory_space<vmem>>, vector<1x1x8x128xf32>
    %42 = vector.shape_cast %41 : vector<1x1x8x128xf32> to vector<8x128xf32>
    %43 = vector.shape_cast %40 : vector<8x128xf32> to vector<1x1x8x128xf32>
    tpu.vector_store %arg5[%c0_32, %c0_33, %c0_34, %c0_35], %43 {strides = array<i32>} : memref<1x4x8x128xf32, #tpu.memory_space<vmem>>, vector<1x1x8x128xf32>,
    %44 = arith.subf %36, %38 : vector<8x128xf32>
    %c0_36 = arith.constant 0 : index
    %c1_37 = arith.constant 1 : index
    %c0_38 = arith.constant 0 : index
    %c0_39 = arith.constant 0 : index
    %45 = vector.load %arg5[%c0_36, %c1_37, %c0_38, %c0_39] : memref<1x4x8x128xf32, #tpu.memory_space<vmem>>, vector<1x1x8x128xf32>
    %46 = vector.shape_cast %45 : vector<1x1x8x128xf32> to vector<8x128xf32>
    %47 = vector.shape_cast %44 : vector<8x128xf32> to vector<1x1x8x128xf32>
    tpu.vector_store %arg5[%c0_36, %c1_37, %c0_38, %c0_39], %47 {strides = array<i32>} : memref<1x4x8x128xf32, #tpu.memory_space<vmem>>, vector<1x1x8x128xf32>,
    %48 = arith.subf %37, %39 : vector<8x128xf32>
    %c0_40 = arith.constant 0 : index
    %c2_41 = arith.constant 2 : index
    %c0_42 = arith.constant 0 : index
    %c0_43 = arith.constant 0 : index
    %49 = vector.load %arg5[%c0_40, %c2_41, %c0_42, %c0_43] : memref<1x4x8x128xf32, #tpu.memory_space<vmem>>, vector<1x1x8x128xf32>
    %50 = vector.shape_cast %49 : vector<1x1x8x128xf32> to vector<8x128xf32>
    %51 = vector.shape_cast %48 : vector<8x128xf32> to vector<1x1x8x128xf32>
    tpu.vector_store %arg5[%c0_40, %c2_41, %c0_42, %c0_43], %51 {strides = array<i32>} : memref<1x4x8x128xf32, #tpu.memory_space<vmem>>, vector<1x1x8x128xf32>,
    %52 = arith.addf %37, %39 : vector<8x128xf32>
    %c0_44 = arith.constant 0 : index
    %c3_45 = arith.constant 3 : index
    %c0_46 = arith.constant 0 : index
    %c0_47 = arith.constant 0 : index
    %53 = vector.load %arg5[%c0_44, %c3_45, %c0_46, %c0_47] : memref<1x4x8x128xf32, #tpu.memory_space<vmem>>, vector<1x1x8x128xf32>
    %54 = vector.shape_cast %53 : vector<1x1x8x128xf32> to vector<8x128xf32>
    %55 = vector.shape_cast %52 : vector<8x128xf32> to vector<1x1x8x128xf32>
    tpu.vector_store %arg5[%c0_44, %c3_45, %c0_46, %c0_47], %55 {strides = array<i32>} : memref<1x4x8x128xf32, #tpu.memory_space<vmem>>, vector<1x1x8x128xf32>,
    return
  }
  func.func @transform_0(%arg0: i32, %arg1: i32, %arg2: i32) -> (i32, i32, i32, i32) {
    %c0_i32 = arith.constant 0 : i32
    %c0_i32_0 = arith.constant 0 : i32
    return %arg2, %c0_i32, %arg0, %arg1 : i32, i32, i32, i32
  }
  func.func @transform_1(%arg0: i32, %arg1: i32, %arg2: i32) -> (i32, i32, i32) {
    %c0_i32 = arith.constant 0 : i32
    %c0_i32_0 = arith.constant 0 : i32
    return %c0_i32, %arg0, %arg1 : i32, i32, i32
  }
  func.func @transform_2(%arg0: i32, %arg1: i32, %arg2: i32) -> (i32, i32, i32, i32) {
    %c0_i32 = arith.constant 0 : i32
    %c0_i32_0 = arith.constant 0 : i32
    return %arg2, %c0_i32, %arg0, %arg1 : i32, i32, i32, i32
  }
}

</mosaic_0001>

<bundles_post_ra>
// kernel: tpu_custom_call.1
= control target key start
LH: loop header
LB: loop body
LE: loop exit
PB: predicated region body
PF: predicated region fallthrough
CT: control target
= control target key end

     0   :  { %7 = vsyncpa [#allocation3], 0  ;;  %s883_s0 = inlined_call_operand.hbm [shape: f32[2,4,8,128], index: 0, kind: input, shape index: {}]   ;;  %s884_s1 = inlined_call_operand.hbm [shape: f32[8,8,128], index: 1, kind: input, shape index: {}]   ;;  %s885_s2 = inlined_call_operand.hbm [shape: f32[2,4,8,128], index: 2, kind: output, shape index: {}]  }
   0x1   :  { %9 = vsyncpa [#allocation3 + $0x1], 0 }
   0x2   :  { %10 = vsyncpa [#allocation6], 0 }
   0x3   :  { %11 = vsyncpa [#allocation4], 0 }
   0x4   :  { %13 = vsyncpa [#allocation4 + $0x1], 0  ;;  %s654_s9 = smov 0   ;;  %s656_s10 = smov 0  }
   0x5   :  { %s658_s11 = smov 0   ;;  %s660_s12 = smov 0  }
   0x6   :  { %s662_s13 = smov 0   ;;  %s664_s14 = smov 0  }
   0x7 LB: > { %s384_s15 = sadd.s32 4294967295, %s630_s14   ;;  %s385_s16 = sadd.s32 4294967294, %s630_s14   ;;  %s630_s14 = sphi %s664_s14, %s19_s14   ;;  %s626_s13 = sphi %s662_s13, %s909_s13   ;;  %s622_s12 = sphi %s660_s12, %s908_s12   ;;  %s618_s11 = sphi %s658_s11, %s907_s11   ;;  %s614_s10 = sphi %s656_s10, %s906_s10   ;;  %s610_s9 = sphi %s654_s9, %s905_s9  }
   0x8   : > { %p62_p0 = scmp.ne.s32.totalorder %s614_s10, %s610_s9  ;;  %p688_p1 = scmp.eq.s32.totalorder %s384_s15, 0 }
   0x9   : > { %p692_p2 = scmp.eq.s32.totalorder %s384_s15, 1  ;;  %p124_p3 = scmp.eq.s32.totalorder %s385_s16, 1 }
   0xa   : > { %s890_s17 = scalar_select %p688_p1, 1, 0 }
   0xb   : > { %s891_s18 = scalar_select %p692_p2, 1, 0 }
   0xc   : > { %p698_p4 = por %p688_p1, %p62_p0  ;;  %p386_p5 = scmp.ge.s32.totalorder %s630_s14, 1 }
   0xd   : > { %p703_p6 = por %p124_p3, %p62_p0  ;;  %p131_p7 = scmp.lt.s32.totalorder %s630_s14, 3 }
   0xe   : > { %s892_s19 = scalar_select %p698_p4, 1, 0 }
   0xf   : > { %s893_s20 = scalar_select %p703_p6, 1, 0 }
  0x10   : > { %p708_p8 = pnand %p386_p5, %p131_p7  ;;  %s632_s22 = smov [#allocation5]  }
  0x11   : > { %s146_s23 = sshll.u32 %s632_s22, 4  ;;  %s31_s25 = sadd.s32 1, %s626_s13  ;;  %s147_s23 = int_to_ptr.vmem [resolvable:$true] %s146_s23 }
  0x12   : > { %s894_s21 = scalar_select %p708_p8, 1, 0 }
  0x13   : > { %p417_p9 = pneg %p708_p8  ;;  %s486_s28 = scalar_lea.hbm %s884_s1, 1024 }
  0x14   : > { %p487_p12 = scmp.ne.s32.totalorder %s884_s1, %s486_s28  ;;  %p493_p5 = scmp.lt.u32.totalorder %s486_s28, %s884_s1 }
  0x15   : > { %p717_p11 = pnand %p417_p9, %p688_p1 }
  0x17   : > { %p488_p13 = pneg %p717_p11 }
  0x19   : > { %p489_p0 = pnand %p488_p13, %p487_p12 }
  0x1b   : > { %p490_p3 = pneg %p489_p0 }
  0x1d   : > { %p495_p7 = pnand %p493_p5, %p490_p3 }
  0x1f   : > { %498 = shalt.err (!%p495_p7)
}
  0x20   : > { %s499_s5 = scalar_lea.vmem %s147_s23, 1024  ;;  %p507_p1 = scmp.lt.s32.totalorder %s147_s23, %s147_s23 }
  0x21   : > { %p500_p9 = scmp.ne.s32.totalorder %s147_s23, %s499_s5  ;;  %p508_p4 = scmp.lt.s32.totalorder %s499_s5, %s499_s5 }
  0x23   : > { %p502_p10 = pnand %p500_p9, %p488_p13  ;;  %p509_p8 = por %p508_p4, %p507_p1 }
  0x25   : > { %p503_p6 = pneg %p502_p10 }
  0x27   : > { %p510_p2 = pnand %p509_p8, %p503_p6 }
  0x29   : > { %513 = shalt.err (!%p510_p2)
}
  0x2a   : > { %s633_s6 = smov 128   ;;  %s634_s7 = smov 8  }
  0x2b   : > { %420 = dma.hbm_to_vmem [thread:$0]  (!%p717_p11), %s884_s1, 1024, %s147_s23, [#allocation6], %s633_s6, %s633_s6, %s634_s7  }
  0x2c   : > { %p32_p1 = scmp.ge.s32.totalorder %s31_s25, 2  ;;  %s49_s16 = sadd.s32 1, %s618_s11 }
  0x2d   : > { %p56_p2 = scmp.ne.s32.totalorder %s618_s11, %s614_s10  ;;  %p57_p4 = scmp.eq.s32.totalorder %s630_s14, 0 }
  0x2e   : > { %s911_s25 = smov (%p32_p1, %s31_s25), 0  ;;  %p897_p8 = scmp.ne.s32.totalorder %s891_s18, 0 }
  0x2f   : > { %p747_p6 = por %p57_p4, %p56_p2  ;;  %s42_s26 = ssub.s32 %s626_s13, %s911_s25 }
  0x30   : > { %p753_p10 = por %p897_p8, %p56_p2  ;;  %p430_p12 = scmp.lt.s32.totalorder %s630_s14, 2 }
  0x31   : > { %p47_p11 = scmp.eq.s32.totalorder %s42_s26, 0  ;;  %s160_s23 = sand.u32 1, %s618_s11  }
  0x32   : > { %s389_s27 = sshll.u32 %s160_s23, 5  ;;  %s407_s29 = sshll.u32 %s626_s13, 9 }
  0x33   : > { %s762_s28 = scalar_select %p47_p11, %s618_s11, %s49_s16  }
  0x34   : > { %s768_s4 = scalar_lea.hbm %s883_s0, %s407_s29  ;;  %s164_s18 = scalar_lea.vmem [#allocation2], %s389_s27 }
  0x35   : > { %s173_s5 = sshll.u32 %s164_s18, 4  ;;  %p774_p13 = pnand %p430_p12, %p747_p6  ;;  %s770_s5 = int_to_ptr.vmem [resolvable:$true] %s173_s5 }
  0x36   : > { %s778_s15 = scalar_lea.sflag [#allocation3], %s160_s23  ;;  %s514_s16 = scalar_lea.hbm %s768_s4, 512 }
  0x37   : > { %p515_p0 = scmp.ne.s32.totalorder %s768_s4, %s514_s16  ;;  %p516_p3 = pneg %p774_p13 }
  0x38   : > { %s519_s22 = scalar_lea.hbm %s883_s0, 1024  ;;  %p520_p9 = scmp.lt.u32.totalorder %s768_s4, %s883_s0 }
  0x39   : > { %p517_p5 = pnand %p516_p3, %p515_p0  ;;  %p521_p1 = scmp.lt.u32.totalorder %s519_s22, %s514_s16 }
  0x3a   : > { %p523_p4 = scmp.lt.u32.totalorder %s514_s16, %s768_s4 }
  0x3b   : > { %p518_p7 = pneg %p517_p5  ;;  %p522_p2 = por %p521_p1, %p520_p9 }
  0x3d   : > { %p524_p6 = por %p523_p4, %p522_p2 }
  0x3f   : > { %p525_p8 = pnand %p524_p6, %p518_p7 }
  0x41   : > { %528 = shalt.err (!%p525_p8)
}
  0x42   : > { %s529_s23 = scalar_lea.vmem %s770_s5, 512  ;;  %s635_s3 = smov [#allocation2]  }
  0x43   : > { %p530_p12 = scmp.ne.s32.totalorder %s770_s5, %s529_s23  ;;  %s534_s18 = sshll.u32 %s635_s3, 4  ;;  %s535_s18 = int_to_ptr.vmem [resolvable:$false] %s534_s18 }
  0x44   : > { %s536_s26 = scalar_lea.vmem %s535_s18, 1024  ;;  %p537_p5 = scmp.lt.s32.totalorder %s770_s5, %s535_s18 }
  0x45   : > { %p532_p11 = pnand %p530_p12, %p516_p3  ;;  %p538_p9 = scmp.lt.s32.totalorder %s536_s26, %s529_s23 }
  0x47   : > { %p533_p0 = pneg %p532_p11  ;;  %p539_p1 = por %p538_p9, %p537_p5 }
  0x49   : > { %p540_p2 = pnand %p539_p1, %p533_p0 }
  0x4b   : > { %543 = shalt.err (!%p540_p2)
}
  0x4c   : > { %424 = dma.hbm_to_vmem [thread:$0]  (!%p774_p13), %s768_s4, 512, %s770_s5, %s778_s15, %s633_s6, %s633_s6, %s634_s7  }
  0x4d   : > { %p900_p3 = scmp.ne.s32.totalorder %s894_s21, 0 }
  0x4e   : > { %s812_s16 = sand.u32 (!%p900_p3), 1, %s614_s10   ;;  %p901_p7 = scmp.ne.s32.totalorder (!%p900_p3), %s892_s19, 0 }
  0x4f   : > { %185 = sbr.rel (%p900_p3) target bundleno = 119 (0x77), region = 28  ;;  %s393_s27 = sshll.u32 (!%p900_p3), %s812_s16, 5 }
  0x50   : > { %s188_s22 = scalar_lea.sflag (!%p900_p3), [#allocation3], %s812_s16  ;;  %s191_s8 = scalar_lea.vmem (!%p900_p3), [#allocation2], %s393_s27 }
  0x56   : > { %597 = dma.done.wait (%p901_p7), %s188_s22, 512  }
  0x57   : > { %599 = vsyncadd (%p901_p7), %s188_s22, 4294966784  ;;  %p902_p13 = scmp.ne.s32.totalorder %s890_s17, 0 }
  0x59   : > { %601 = dma.done.wait (%p902_p13), [#allocation6], 1024  }
  0x5a   : > { %603 = vsyncadd (%p902_p13), [#allocation6], 4294966272  ;;  %v216_v0 = vld [vmem:[%s191_s8] sm:$0xff]  ;;  %v396_v1 = vld [vmem:[%s191_s8 + $0x8] sm:$0xff]  ;;  %s215_s17 = scalar_lea.vmem [#allocation7], %s393_s27  ;;  %s408_s21 = sshll.u32 %s622_s12, 9 }
  0x5b   : > { %v397_v2 = vld [vmem:[%s191_s8 + $0x10] sm:$0xff]  ;;  %v398_v3 = vld [vmem:[%s191_s8 + $0x18] sm:$0xff]  ;;  %v223_v4 = vld [vmem:[#allocation5] sm:$0xff]  ;;  %s281_s19 = sshll.u32 %s215_s17, 4  ;;  %s834_s4 = scalar_lea.hbm %s885_s2, %s408_s21  ;;  %s829_s19 = int_to_ptr.vmem [resolvable:$true] %s281_s19 }
  0x5c   : > { %v226_v5 = vld [vmem:[#allocation5 + $0x8] sm:$0xff]  ;;  %v224_v6 = vmul.f32 %v223_v4, %v216_v0  ;;  %v230_v8 = vld [vmem:[#allocation5 + $0x10] sm:$0xff]  ;;  %v233_v9 = vld [vmem:[#allocation5 + $0x18] sm:$0xff]  ;;  %s266_s12 = scalar_lea.sflag [#allocation4], %s812_s16  ;;  %s544_s5 = scalar_lea.vmem %s829_s19, 512 }
  0x5d   : > { %v227_v7 = vmul.f32 %v396_v1, %v226_v5  ;;  %v237_v10 = vld [vmem:[#allocation5 + $0x20] sm:$0xff]  ;;  %v231_v11 = vmul.f32 %v230_v8, %v216_v0  ;;  %v234_v12 = vmul.f32 %v396_v1, %v233_v9  ;;  %v240_v14 = vld [vmem:[#allocation5 + $0x28] sm:$0xff]  ;;  %v244_v15 = vld [vmem:[#allocation5 + $0x30] sm:$0xff]  ;;  %p545_p4 = scmp.ne.s32.totalorder %s829_s19, %s544_s5  ;;  %s636_s15 = smov [#allocation7]  }
  0x5e   : > { %v238_v13 = vmul.f32 %v397_v2, %v237_v10  ;;  %v247_v16 = vld [vmem:[#allocation5 + $0x38] sm:$0xff]  ;;  %v241_v18 = vmul.f32 %v398_v3, %v240_v14  ;;  %v245_v19 = vmul.f32 %v397_v2, %v244_v15  ;;  %s548_s29 = sshll.u32 %s636_s15, 4  ;;  %s549_s29 = int_to_ptr.vmem [resolvable:$false] %s548_s29 }
  0x5f   : > { %v228_v17 = vadd.f32 %v227_v7, %v224_v6  ;;  %v248_v20 = vmul.f32 %v398_v3, %v247_v16  ;;  %v235_v21 = vadd.f32 %v234_v12, %v231_v11  ;;  %p546_p6 = pnand %p545_p4, %p753_p10  ;;  %s550_s30 = scalar_lea.vmem %s549_s29, 1024 }
  0x60   : > { %v242_v22 = vadd.f32 %v241_v18, %v238_v13  ;;  %p551_p12 = scmp.lt.s32.totalorder %s829_s19, %s549_s29  ;;  %p552_p11 = scmp.lt.s32.totalorder %s550_s30, %s544_s5 }
  0x61   : > { %v249_v23 = vadd.f32 %v248_v20, %v245_v19  ;;  %p547_p8 = pneg %p546_p6 }
  0x62   : > { %v250_v24 = vadd.f32 %v242_v22, %v228_v17  ;;  %v251_v26 = vsub.f32 %v228_v17, %v242_v22  ;;  %p553_p0 = por %p552_p11, %p551_p12 }
  0x63   : > { %v252_v25 = vadd.f32 %v249_v23, %v235_v21  ;;  %v253_v27 = vsub.f32 %v235_v21, %v249_v23 }
  0x64   : > { %p554_p5 = pnand %p553_p0, %p547_p8 }
  0x65   : > { %v254_v28 = vadd.f32 %v252_v25, %v250_v24  ;;  %v256_v29 = vsub.f32 %v250_v24, %v252_v25  ;;  %v259_v30 = vsub.f32 %v251_v26, %v253_v27  ;;  %v262_v31 = vadd.f32 %v253_v27, %v251_v26 }
  0x67   : > { %255 = vst [vmem:[%s215_s17] sm:$0xff] %v254_v28  ;;  %399 = vst [vmem:[%s215_s17 + $0x8] sm:$0xff] %v256_v29 }
  0x68   : > { %400 = vst [vmem:[%s215_s17 + $0x10] sm:$0xff] %v259_v30  ;;  %401 = vst [vmem:[%s215_s17 + $0x18] sm:$0xff] %v262_v31 }
  0x69   : > { %557 = shalt.err (!%p554_p5)
}
  0x6a   : > { %s558_s23 = scalar_lea.hbm %s834_s4, 512  ;;  %s562_s26 = scalar_lea.hbm %s885_s2, 1024 }
  0x6b   : > { %p559_p9 = scmp.ne.s32.totalorder %s834_s4, %s558_s23  ;;  %p563_p3 = scmp.lt.u32.totalorder %s834_s4, %s885_s2 }
  0x6c   : > { %p564_p7 = scmp.lt.u32.totalorder %s562_s26, %s558_s23  ;;  %p566_p4 = scmp.lt.u32.totalorder %s558_s23, %s834_s4 }
  0x6d   : > { %p560_p1 = pnand %p559_p9, %p753_p10 }
  0x6e   : > { %p565_p13 = por %p564_p7, %p563_p3 }
  0x6f   : > { %p561_p2 = pneg %p560_p1 }
  0x70   : > { %p567_p6 = por %p566_p4, %p565_p13 }
  0x72   : > { %p568_p8 = pnand %p567_p6, %p561_p2 }
  0x74   : > { %571 = shalt.err (!%p568_p8)
}
  0x75   : > { %s637_s8 = smov 128   ;;  %s638_s17 = smov 8  }
  0x76   : > { %415 = dma.vmem_to_hbm [thread:$0]  (%p753_p10), %s829_s19, 512, %s834_s4, %s266_s12, %s637_s8, %s637_s8, %s638_s17  }
  0x77 PF: > { %s296_s21 = sand.u32 1, %s610_s9   ;;  %p903_p12 = scmp.ne.s32.totalorder %s893_s20, 0 }
  0x78   : > { %p904_p11 = scmp.ge.s32.totalorder %s630_s14, 2  ;;  %s297_s6 = scalar_lea.sflag [#allocation4], %s296_s21 }
  0x7a   : > { %p426_p0 = pnand %p904_p11, %p903_p12 }
  0x7c   : > { %605 = dma.done.wait (!%p426_p0), %s297_s6, 512  }
  0x7d   : > { %607 = vsyncadd (!%p426_p0), %s297_s6, 4294966784  ;;  %s19_s14 = sadd.s32 1, %s630_s14   ;;  %s905_s9 = smov %s614_s10 }
  0x7e   : > { %p16_p5 = scmp.ge.s32.totalorder %s19_s14, 4   ;;  %s906_s10 = smov %s618_s11 }
  0x7f   : > { %s907_s11 = smov %s762_s28  ;;  %s908_s12 = smov %s626_s13 }
  0x80   : > { %s909_s13 = smov %s911_s25  ;;  %18 = sbr.rel (!%p16_p5) target bundleno = 7 (0x7), region = 91 }
  0x87   :  { %302 = vsyncpa [#allocation3], 1 }
  0x88   :  { %304 = vsyncpa [#allocation3 + $0x1], 1 }
  0x89   :  { %305 = vsyncpa [#allocation6], 1 }
  0x8a   :  { %306 = vsyncpa [#allocation4], 1 }
  0x8b   :  { %308 = vsyncpa [#allocation4 + $0x1], 1 }

</bundles_post_ra>
